<compile_context>
chip_gen: v7x
topology: tpu7x:2x2x1
jax: 0.10.0
libtpu: 0.0.40
codegen_flags: <defaults>
</compile_context>

<pallas_src>
import jax
import jax.numpy as jnp
from jax.experimental import pallas as pl
from jax.experimental.pallas import tpu as pltpu


_LANES = 128                 # lane-dense last dim
_BLOCK_BYTES = 4 << 20       # ~4 MiB per input block per stream
_MIN_PALLAS_BYTES = 256 * 1024  # below this, a fused XLA multiply is cheaper


def _round_up(x, m):
    return (x + m - 1) // m * m


def _param_kernel(scale_ref, x_ref, o_ref):
    # scale_ref: (1,) f32 in SMEM holding weight.mean().
    # x_ref / o_ref: (tr, 128) VMEM tiles. Pure elementwise scale in the
    # native dtype (keeps packed dtypes packed; no VLIW slot saturates before
    # HBM, so all tuning lives in the DMA/tiling, not here).
    o_ref[...] = x_ref[...] * scale_ref[0].astype(x_ref.dtype)


def param_forward(weight, inp, *, min_pallas_bytes=_MIN_PALLAS_BYTES):
    """Pallas equivalent of Param.forward: weight.mean() * inp (any shape)."""
    # Scalar mean, hoisted out of the per-tile path (always accumulated in f32).
    scale = jnp.mean(weight.astype(jnp.float32))

    # Non-floating inputs: let XLA handle type promotion (matches PyTorch's
    # float-category-wins promotion, e.g. int32 input -> f32 output).
    if not jnp.issubdtype(inp.dtype, jnp.floating):
        return scale * inp

    total = inp.size
    itemsize = jnp.dtype(inp.dtype).itemsize

    # Fallback to a single fused XLA elementwise op when the Pallas path can't
    # win: tiny tensors (launch overhead dominates) or totals not divisible by
    # 128 (any pad/slice/concat around the custom call adds full HBM passes).
    if (
        total == 0
        or total % _LANES != 0
        or total * itemsize < min_pallas_bytes
    ):
        return scale.astype(inp.dtype) * inp

    rows = total // _LANES
    x2d = inp.reshape(rows, _LANES)          # zero-copy lane-dense slab

    # Byte-based block cap: ~4 MiB per stream, rounded to a sublane multiple.
    cap_rows = max(8, (_BLOCK_BYTES // (_LANES * itemsize)) // 8 * 8)
    if rows <= cap_rows:
        if rows > 1024:
            # Split into >=2 parallel blocks so both v7x TensorCores stream;
            # gated on size so small inputs don't pay an extra grid step.
            tr = min(cap_rows, _round_up(pl.cdiv(rows, 2), 8))
        else:
            tr = rows                         # full-extent block (always legal)
    else:
        tr = cap_rows
    grid = (pl.cdiv(rows, tr),)

    # Keep the double-buffered footprint (2 streams x 2 buffers x block) legal
    # on every generation (v5e: 16 MiB scoped default, v7x: 64 MiB physical).
    block_bytes = tr * _LANES * itemsize
    vmem_limit_bytes = int(min(48 << 20, max(24 << 20, 4 * block_bytes + (4 << 20))))

    out2d = pl.pallas_call(
        _param_kernel,
        out_shape=jax.ShapeDtypeStruct((rows, _LANES), inp.dtype),
        grid_spec=pltpu.PrefetchScalarGridSpec(
            num_scalar_prefetch=0,
            grid=grid,
            in_specs=[
                # Tiny scalar lives in SMEM; no VMEM double-buffer stream.
                pl.BlockSpec(memory_space=pltpu.MemorySpace.SMEM),
                # Lane-dense row tiles of the input.
                pl.BlockSpec((tr, _LANES), lambda i: (i, 0)),
            ],
            out_specs=pl.BlockSpec((tr, _LANES), lambda i: (i, 0)),
        ),
        compiler_params=pltpu.CompilerParams(
            # Independent row blocks -> parallel (lets v7x use both TCs).
            dimension_semantics=("parallel",),
            vmem_limit_bytes=vmem_limit_bytes,
        ),
    )(scale.reshape(1), x2d)

    return out2d.reshape(inp.shape)


if __name__ == "__main__":
    key = jax.random.PRNGKey(0)
    k_w, k_x = jax.random.split(key)

    size = 32                                                  # nn.Parameter(torch.randn(size))
    weight = jax.random.normal(k_w, (size,), dtype=jnp.float32)
    x = jax.random.normal(k_x, (2, 4, 16, 16), dtype=jnp.float32)  # NCHW, total = 2048

    ref = jnp.mean(weight) * x

    # Force the Pallas path for the small demo shape (128-aligned total).
    out = param_forward(weight, x, min_pallas_bytes=0)
    jax.block_until_ready(out)
    assert out.shape == x.shape and out.dtype == x.dtype
    assert jnp.allclose(out, ref, rtol=1e-6, atol=1e-6)

    # Default path (small-input fused-XLA fallback) must agree too.
    out2 = param_forward(weight, x)
    jax.block_until_ready(out2)
    assert jnp.allclose(out2, ref, rtol=1e-6, atol=1e-6)

    print("KERNEL_OK")
</pallas_src>

<mosaic_0001>
module attributes {stable_mosaic.version = 11 : i64} {
  func.func @_param_kernel(%arg0: i32, %arg1: memref<1xf32, #tpu.memory_space<smem>>, %arg2: memref<16x128xf32, #tpu.memory_space<vmem>>, %arg3: memref<16x128xf32, #tpu.memory_space<vmem>>) attributes {dimension_semantics = [#tpu.dimension_semantics<parallel>], iteration_bounds = array<i64: 1>, scalar_prefetch = 0 : i64, scratch_operands = 0 : i64, tpu.core_type = #tpu.core_type<tc>, window_params = [{transform_indices = @transform_0, window_bounds = array<i64: 1>}, {transform_indices = @transform_1, window_bounds = array<i64: 16, 128>}, {transform_indices = @transform_2, window_bounds = array<i64: 16, 128>}]} {
    %c0 = arith.constant 0 : index
    %c0_0 = arith.constant 0 : index
    %0 = vector.load %arg2[%c0, %c0_0] : memref<16x128xf32, #tpu.memory_space<vmem>>, vector<16x128xf32>
    %c0_1 = arith.constant 0 : index
    %1 = memref.load %arg1[%c0_1] : memref<1xf32, #tpu.memory_space<smem>>
    %2 = vector.broadcast %1 : f32 to vector<16x128xf32>
    %3 = arith.mulf %0, %2 : vector<16x128xf32>
    %c0_2 = arith.constant 0 : index
    %c0_3 = arith.constant 0 : index
    %4 = vector.load %arg3[%c0_2, %c0_3] : memref<16x128xf32, #tpu.memory_space<vmem>>, vector<16x128xf32>
    tpu.vector_store %arg3[%c0_2, %c0_3], %3 {strides = array<i32>} : memref<16x128xf32, #tpu.memory_space<vmem>>, vector<16x128xf32>,
    return
  }
  func.func @transform_0(%arg0: i32) -> i32 {
    %c0_i32 = arith.constant 0 : i32
    %c0_i32_0 = arith.constant 0 : i32
    return %c0_i32 : i32
  }
  func.func @transform_1(%arg0: i32) -> (i32, i32) {
    %c0_i32 = arith.constant 0 : i32
    %c0_i32_0 = arith.constant 0 : i32
    return %arg0, %c0_i32 : i32, i32
  }
  func.func @transform_2(%arg0: i32) -> (i32, i32) {
    %c0_i32 = arith.constant 0 : i32
    %c0_i32_0 = arith.constant 0 : i32
    return %arg0, %c0_i32 : i32, i32
  }
}

</mosaic_0001>

<bundles_post_ra>
// kernel: tpu_custom_call.1
= control target key start
LH: loop header
LB: loop body
LE: loop exit
PB: predicated region body
PF: predicated region fallthrough
CT: control target
= control target key end

     0   :  { %8 = vsyncpa [#allocation4], 0  ;;  %s156_s0 = inlined_call_operand.<no memory space> [shape: f32[1], index: 0, kind: input, shape index: {}]   ;;  %s157_s1 = inlined_call_operand.hbm [shape: f32[16,128], index: 1, kind: input, shape index: {}]   ;;  %s158_s2 = inlined_call_operand.hbm [shape: f32[16,128], index: 2, kind: output, shape index: {}]  }
   0x1   :  { %9 = vsyncpa [#allocation5], 0  ;;  %s104_s9 = smov [#allocation3]   ;;  %s56_s13 = scalar_lea.hbm %s157_s1, 256 }
   0x2   :  { %s17_s10 = sshll.u32 %s104_s9, 4  ;;  %p57_p0 = scmp.ne.s32.totalorder %s157_s1, %s56_s13  ;;  %s18_s10 = int_to_ptr.vmem [resolvable:$true] %s17_s10 }
   0x3   :  { %p60_p1 = scmp.lt.u32.totalorder %s56_s13, %s157_s1 }
   0x5   :  { %p62_p2 = pnand %p60_p1, %p57_p0 }
   0x7   :  { %65 = shalt.err (!%p62_p2)
}
   0x8   :  { %s66_s18 = scalar_lea.vmem %s18_s10, 256  ;;  %p71_p4 = scmp.lt.s32.totalorder %s18_s10, %s18_s10 }
   0x9   :  { %p67_p3 = scmp.ne.s32.totalorder %s18_s10, %s66_s18  ;;  %p72_p5 = scmp.lt.s32.totalorder %s66_s18, %s66_s18 }
   0xb   :  { %p73_p6 = por %p72_p5, %p71_p4 }
   0xd   :  { %p74_p7 = pnand %p73_p6, %p67_p3 }
   0xf   :  { %77 = shalt.err (!%p74_p7)
}
  0x10   :  { %s105_s19 = smov 128   ;;  %s106_s20 = smov 8  }
  0x11   :  { %23 = dma.hbm_to_vmem [thread:$0]  %s157_s1, 256, %s18_s10, [#allocation4], %s105_s19, %s105_s19, %s106_s20  }
  0x12   :  { %100 = dma.done.wait [#allocation4], 256  }
  0x13   :  { %101 = vsyncadd [#allocation4], 4294967040  ;;  %v30_v0 = vstv %s156_s0  ;;  %s107_s25 = smov [#allocation6]   ;;  %v27_v1 = vld [vmem:[#allocation3] sm:$0xff]  ;;  %v28_v2 = vld [vmem:[#allocation3 + $0x8] sm:$0xff] }
  0x14   :  { %s40_s26 = sshll.u32 %s107_s25, 4  ;;  %v31_v3 = vmul.f32 %v30_v0, %v27_v1  ;;  %v32_v4 = vmul.f32 %v30_v0, %v28_v2  ;;  %s41_s26 = int_to_ptr.vmem [resolvable:$true] %s40_s26 }
  0x15   :  { %s78_s27 = scalar_lea.vmem %s41_s26, 256  ;;  %p83_p9 = scmp.lt.s32.totalorder %s41_s26, %s41_s26 }
  0x16   :  { %33 = vst [vmem:[#allocation6] sm:$0xff] %v31_v3  ;;  %34 = vst [vmem:[#allocation6 + $0x8] sm:$0xff] %v32_v4  ;;  %p79_p8 = scmp.ne.s32.totalorder %s41_s26, %s78_s27  ;;  %p84_p10 = scmp.lt.s32.totalorder %s78_s27, %s78_s27 }
  0x18   :  { %p85_p11 = por %p84_p10, %p83_p9 }
  0x1a   :  { %p86_p12 = pnand %p85_p11, %p79_p8 }
  0x1c   :  { %89 = shalt.err (!%p86_p12)
}
  0x1d   :  { %s90_s0 = scalar_lea.hbm %s158_s2, 256 }
  0x1e   :  { %p91_p13 = scmp.ne.s32.totalorder %s158_s2, %s90_s0  ;;  %p94_p0 = scmp.lt.u32.totalorder %s90_s0, %s158_s2 }
  0x20   :  { %p96_p1 = pnand %p94_p0, %p91_p13 }
  0x22   :  { %99 = shalt.err (!%p96_p1)
}
  0x23   :  { %46 = dma.vmem_to_hbm [thread:$0]  %s41_s26, 256, %s158_s2, [#allocation5], %s105_s19, %s105_s19, %s106_s20  }
  0x24   :  { %102 = dma.done.wait [#allocation5], 256  }
  0x25   :  { %103 = vsyncadd [#allocation5], 4294967040 }
  0x26   :  { %50 = vsyncpa [#allocation4], 1 }
  0x27   :  { %51 = vsyncpa [#allocation5], 1 }

</bundles_post_ra>
